<compile_context>
chip_gen: v5e
topology: v5e:2x2
jax: 0.10.0
libtpu: 0.0.40
codegen_flags: <defaults>
</compile_context>

<pallas_src>
from functools import partial

import numpy as np
import jax
import jax.numpy as jnp
from jax.experimental import pallas as pl
from jax.experimental.pallas import tpu as pltpu


def _round_up(x, m):
    return ((x + m - 1) // m) * m


def _supports_buffered():
    """Narrow feature check for BlockSpec(pipeline_mode=pl.Buffered(1))."""
    if not hasattr(pl, "Buffered"):
        return False
    try:
        pl.BlockSpec((8, 128), lambda i: (0, 0), pipeline_mode=pl.Buffered(1))
        return True
    except TypeError:
        return False


_HAS_BUFFERED = _supports_buffered()


def _device_kind():
    try:
        return jax.devices()[0].device_kind.lower()
    except Exception:
        return ""


# -----------------------------------------------------------------------------
# Pallas kernel: fused  dense -> tanh -> out_proj  on gathered SEP features.
#   grid = (N tiles, K tiles);  K tiles the contraction dim of the 1st matmul.
# -----------------------------------------------------------------------------
def sent_head_kernel(x_ref, w1_ref, b1_ref, w2_ref, b2_ref, y_ref, h_ref, acc_ref):
    # x_ref : (TILE_N, TILE_K) bf16   gathered SEP-feature tile (K slice)
    # w1_ref: (TILE_K, Hp)     bf16   dense weight slice, (in, out) layout
    # b1_ref: (1, Hp)          f32
    # w2_ref: (Hp, Lp)         bf16   out_proj weight, (in, out) layout
    # b2_ref: (1, Lp)          f32
    # acc_ref: (TILE_N, Hp)    f32    first-matmul accumulator scratch
    k = pl.program_id(1)

    @pl.when(k == 0)
    def _():
        acc_ref[...] = jnp.zeros_like(acc_ref)

    acc_ref[...] += jnp.dot(x_ref[...], w1_ref[...],
                            preferred_element_type=jnp.float32)

    @pl.when(k == pl.num_programs(1) - 1)
    def _():
        h = jnp.tanh(acc_ref[...] + b1_ref[...])          # f32
        h_low = h.astype(w2_ref.dtype)                    # single bf16 cast
        if h_ref.dtype == w2_ref.dtype:
            h_ref[...] = h_low                            # reuse the cast
        else:
            h_ref[...] = h.astype(h_ref.dtype)
        y = jnp.dot(h_low, w2_ref[...],
                    preferred_element_type=jnp.float32) + b2_ref[...]
        y_ref[...] = y.astype(y_ref.dtype)


def _vmem_limit_bytes(tile_n, tile_k, hp, lp, hidden_bytes, nk):
    """Footprint-derived scoped-VMEM limit (+ headroom)."""
    single = _HAS_BUFFERED
    w1 = (1 if (single and nk == 1) else 2) * tile_k * hp * 2   # bf16 W1 blocks
    cb = 1 if single else 2
    consts = cb * (hp * 4 + hp * lp * 2 + lp * 4)               # b1, W2, b2
    x = 2 * tile_n * tile_k * 2                                 # bf16 x tiles
    y = 2 * tile_n * lp * 4                                     # f32 y tiles
    h = 2 * tile_n * hp * hidden_bytes                          # h tiles
    acc = tile_n * hp * 4                                       # scratch
    footprint = w1 + consts + x + y + h + acc
    return int(min(max(footprint + (4 << 20), 16 << 20), 100 << 20))


def _pick_tiling(n, hp, device_kind):
    """Generation-aware (tile_n, n_pad, tile_k)."""
    kind = device_kind
    is_v5 = "v5" in kind
    is_v7 = "v7" in kind
    n128 = _round_up(max(n, 1), 128)
    if is_v5:
        tile_n = 128                       # 128x128 MXU; 128 is the sweet spot
    elif is_v7:
        tile_n = 256 if n128 >= 512 else 128  # keep >=2 grid steps for 2 TCs
    else:                                   # v6e and friends (256-wide MXU)
        tile_n = 256 if n128 >= 256 else 128
    n_pad = _round_up(max(n, 1), tile_n)

    # K-tiling of W1 only when the full bf16 weight would not fit comfortably.
    w1_budget = (24 << 20) if is_v7 else (48 << 20)
    if hp * hp * 2 <= w1_budget:
        tile_k = hp
    else:
        target = max(128, (w1_budget // (4 * hp)) // 128 * 128)
        tile_k = 128
        for cand in range(target, 127, -128):
            if hp % cand == 0:
                tile_k = cand
                break
    return tile_n, n_pad, tile_k


def sent_head(x, w1_t, b1, w2_t, b2, *, tile_n, tile_k,
              hidden_dtype=jnp.bfloat16, vmem_limit_bytes=None):
    """x: (N_pad, Hp) bf16, N_pad % tile_n == 0, Hp % tile_k == 0.
    Returns (y_pad (N_pad, Lp) f32, h_pad (N_pad, Hp) hidden_dtype)."""
    n_pad, hp = x.shape
    lp = w2_t.shape[1]
    nk = hp // tile_k
    grid = (n_pad // tile_n, nk)
    hidden_bytes = jnp.dtype(hidden_dtype).itemsize

    def const_spec(shape):
        # Grid-invariant weights/biases: single resident VMEM buffer suffices.
        if _HAS_BUFFERED:
            return pl.BlockSpec(shape, lambda i, k: (0, 0),
                                pipeline_mode=pl.Buffered(1))
        return pl.BlockSpec(shape, lambda i, k: (0, 0))

    if nk == 1:
        w1_spec = const_spec((tile_k, hp))              # resident full weight
    else:
        w1_spec = pl.BlockSpec((tile_k, hp), lambda i, k: (k, 0))  # pipelined

    if vmem_limit_bytes is None:
        vmem_limit_bytes = _vmem_limit_bytes(tile_n, tile_k, hp, lp,
                                             hidden_bytes, nk)

    cost = pl.CostEstimate(
        flops=2 * n_pad * hp * (hp + lp),
        transcendentals=n_pad * hp,
        bytes_accessed=(n_pad * hp * 2 + hp * hp * 2 + hp * lp * 2
                        + hp * 4 + lp * 4
                        + n_pad * lp * 4 + n_pad * hp * hidden_bytes),
    )

    return pl.pallas_call(
        sent_head_kernel,
        out_shape=(
            jax.ShapeDtypeStruct((n_pad, lp), jnp.float32),
            jax.ShapeDtypeStruct((n_pad, hp), hidden_dtype),
        ),
        grid_spec=pltpu.PrefetchScalarGridSpec(
            num_scalar_prefetch=0,
            grid=grid,
            in_specs=[
                pl.BlockSpec((tile_n, tile_k), lambda i, k: (i, k)),
                w1_spec,
                const_spec((1, hp)),
                const_spec((hp, lp)),
                const_spec((1, lp)),
            ],
            out_specs=[
                pl.BlockSpec((tile_n, lp), lambda i, k: (i, 0)),
                pl.BlockSpec((tile_n, hp), lambda i, k: (i, 0)),
            ],
            scratch_shapes=[pltpu.VMEM((tile_n, hp), jnp.float32)],
        ),
        compiler_params=pltpu.CompilerParams(
            dimension_semantics=("parallel", "arbitrary"),
            vmem_limit_bytes=int(vmem_limit_bytes),
        ),
        cost_estimate=cost,
    )(x, w1_t, b1, w2_t, b2)


# -----------------------------------------------------------------------------
# Device-side plumbing (gather -> cast -> pad -> kernel -> slice), one jit.
# -----------------------------------------------------------------------------
@partial(jax.jit, static_argnames=("n", "tile_n", "tile_k", "hidden_dtype",
                                   "vmem_limit"))
def _sent_forward_device(features, idx_pad, dense_w, dense_b,
                         out_proj_w, out_proj_b, *, n, tile_n, tile_k,
                         hidden_dtype, vmem_limit):
    B, S, H = features.shape
    L = out_proj_w.shape[0]
    hp = _round_up(H, 128)   # lane-dense hidden
    lp = _round_up(L, 128)   # lane-dense logits (unmasked stores)

    # Gather SEP rows straight into the padded bf16 kernel input.
    x = jnp.take(features.reshape(B * S, H), idx_pad, axis=0).astype(jnp.bfloat16)
    if hp != H:
        x = jnp.pad(x, ((0, 0), (0, hp - H)))

    # PyTorch nn.Linear stores weight as (out, in); the kernel wants (in, out).
    # Zero padding is numerically exact: padded x / W1 columns are zero, padded
    # h columns are tanh(0) = 0 and meet all-zero W2 rows; padded logits are
    # sliced off below.
    w1_t = jnp.pad(dense_w.T, ((0, hp - H), (0, hp - H))).astype(jnp.bfloat16)
    b1 = jnp.pad(dense_b, (0, hp - H)).reshape(1, hp).astype(jnp.float32)
    w2_t = jnp.pad(out_proj_w.T, ((0, hp - H), (0, lp - L))).astype(jnp.bfloat16)
    b2 = jnp.pad(out_proj_b, (0, lp - L)).reshape(1, lp).astype(jnp.float32)

    y_full, h_full = sent_head(x, w1_t, b1, w2_t, b2, tile_n=tile_n,
                               tile_k=tile_k, hidden_dtype=hidden_dtype,
                               vmem_limit_bytes=vmem_limit)
    return y_full[:n, :L], h_full[:n, :H]


# -----------------------------------------------------------------------------
# Host-side SEP-position logic of ClassificationSent.forward (ragged, per
# example), mirroring the PyTorch loop exactly.
# -----------------------------------------------------------------------------
def gather_sep_indices(input_ids_np, labels_np=None):
    B, S = input_ids_np.shape
    b_idx, s_idx, sep_count, sent_labels = [], [], [], []
    for i in range(B):
        ids = input_ids_np[i]
        sep = np.where(ids == 2)[0]
        last = sep[-1]
        if (last < S - 1 and ids[last + 1] == 1) or (last == S - 1):
            used = sep[:-1]
        else:
            used = sep
        trip_sep = int(used.shape[0])
        b_idx.extend([i] * trip_sep)
        s_idx.extend(int(p) for p in used)
        sep_count.extend([i] * trip_sep)   # batch index per kept SEP (as in torch)
        if labels_np is not None:
            sent_labels.append(labels_np[i, :trip_sep])
    b_idx = np.asarray(b_idx, np.int32)
    s_idx = np.asarray(s_idx, np.int32)
    flat_idx = b_idx * S + s_idx
    sep_count = np.asarray(sep_count, np.int32)
    sent_labels = (np.concatenate(sent_labels, axis=0)
                   if labels_np is not None else None)
    return flat_idx, sent_labels, sep_count


def classification_sent_forward(features, input_ids_np, params, labels_np=None,
                                *, hidden_dtype=jnp.bfloat16):
    B, S, H = features.shape
    flat_idx, sent_labels, sep_count = gather_sep_indices(input_ids_np, labels_np)
    n = int(flat_idx.shape[0])

    hp = _round_up(H, 128)
    lp = _round_up(params["out_proj_w"].shape[0], 128)
    tile_n, n_pad, tile_k = _pick_tiling(n, hp, _device_kind())
    vmem_limit = _vmem_limit_bytes(tile_n, tile_k, hp, lp,
                                   jnp.dtype(hidden_dtype).itemsize,
                                   hp // tile_k)

    # Pad the row-index vector so the gathered input is already tile_n-aligned.
    idx_pad = jnp.asarray(np.pad(flat_idx, (0, n_pad - n)), jnp.int32)

    y, h = _sent_forward_device(
        features, idx_pad,
        params["dense_w"], params["dense_b"],
        params["out_proj_w"], params["out_proj_b"],
        n=n, tile_n=tile_n, tile_k=tile_k,
        hidden_dtype=hidden_dtype, vmem_limit=vmem_limit)
    return y, h, sent_labels, sep_count


# -----------------------------------------------------------------------------
# Main: deterministic params/inputs at small shapes.
# -----------------------------------------------------------------------------
if __name__ == "__main__":
    B, S, H, L = 2, 16, 32, 4   # batch, seq, hidden_size, num_labels

    key = jax.random.PRNGKey(0)
    k_feat, k_w1, k_b1, k_w2, k_b2 = jax.random.split(key, 5)

    features = jax.random.normal(k_feat, (B, S, H), dtype=jnp.float32)

    params = {
        "dense_w": jax.random.normal(k_w1, (H, H), dtype=jnp.float32) * 0.05,
        "dense_b": jax.random.normal(k_b1, (H,), dtype=jnp.float32) * 0.05,
        "out_proj_w": jax.random.normal(k_w2, (L, H), dtype=jnp.float32) * 0.05,
        "out_proj_b": jax.random.normal(k_b2, (L,), dtype=jnp.float32) * 0.05,
    }

    # input_ids: 2 == SEP, 1 == PAD.
    # Ex. 0: SEPs at 3, 6, 8; SEP at 8 followed by pad -> drop last -> use [3, 6]
    # Ex. 1: SEPs at 4, 9, 15; last SEP at end of sequence -> drop last -> use [4, 9]
    input_ids = np.full((B, S), 5, dtype=np.int32)
    input_ids[0, [3, 6, 8]] = 2
    input_ids[0, 9:] = 1
    input_ids[1, [4, 9, 15]] = 2

    labels = np.arange(B * S, dtype=np.int32).reshape(B, S) % L

    y, h, sent_labels, sep_count = classification_sent_forward(
        features, input_ids, params, labels_np=labels
    )
    y = jax.block_until_ready(y)
    h = jax.block_until_ready(h)

    # --- reference checks (numpy, mirroring the kernel's bf16-in / f32-acc) ---
    def bf16_round(a):
        return np.asarray(jnp.asarray(a).astype(jnp.bfloat16).astype(jnp.float32))

    flat_idx, _, _ = gather_sep_indices(input_ids, labels)
    feats_np = np.asarray(features).reshape(B * S, H)
    x_rows = feats_np[flat_idx]                                     # (N, H) f32
    w1_np = np.asarray(params["dense_w"]).T
    w2_np = np.asarray(params["out_proj_w"]).T
    b1_np = np.asarray(params["dense_b"])
    b2_np = np.asarray(params["out_proj_b"])

    h_np = np.asarray(jnp.asarray(h, jnp.float32))
    y_np = np.asarray(y)

    # First-stage reference (f32 tanh of bf16-operand matmul); kernel stores bf16.
    h_ref = np.tanh(bf16_round(x_rows) @ bf16_round(w1_np) + b1_np)
    # Second-stage reference uses the kernel's own (bf16) h values.
    y_ref = bf16_round(h_np) @ bf16_round(w2_np) + b2_np
    # Pure-f32 sanity references (bound the total bf16 operand error).
    h_f32 = np.tanh(x_rows @ w1_np + b1_np)
    y_f32 = h_f32 @ w2_np + b2_np

    assert y_np.shape == (4, L) and h_np.shape == (4, H)
    assert np.allclose(h_np, h_ref, atol=1e-2)     # bf16 storage of h
    assert np.allclose(y_np, y_ref, atol=1e-3)
    assert np.allclose(h_np, h_f32, atol=5e-2)
    assert np.allclose(y_np, y_f32, atol=5e-2)
    assert sep_count.tolist() == [0, 0, 1, 1]
    assert sent_labels.tolist() == [int(labels[0, 0]), int(labels[0, 1]),
                                    int(labels[1, 0]), int(labels[1, 1])]

    print("KERNEL_OK")
</pallas_src>

<mosaic_0001>
module attributes {stable_mosaic.version = 11 : i64} {
  func.func @sent_head_kernel(%arg0: i32, %arg1: i32, %arg2: memref<128x128xbf16, #tpu.memory_space<vmem>>, %arg3: memref<128x128xbf16, #tpu.memory_space<vmem>>, %arg4: memref<1x128xf32, #tpu.memory_space<vmem>>, %arg5: memref<128x128xbf16, #tpu.memory_space<vmem>>, %arg6: memref<1x128xf32, #tpu.memory_space<vmem>>, %arg7: memref<128x128xf32, #tpu.memory_space<vmem>>, %arg8: memref<128x128xbf16, #tpu.memory_space<vmem>>, %arg9: memref<128x128xf32, #tpu.memory_space<vmem>>) attributes {dimension_semantics = [#tpu.dimension_semantics<parallel>, #tpu.dimension_semantics<arbitrary>], iteration_bounds = array<i64: 1, 1>, scalar_prefetch = 0 : i64, scratch_operands = 1 : i64, tpu.core_type = #tpu.core_type<tc>, window_params = [{transform_indices = @transform_0, window_bounds = array<i64: 128, 128>}, {pipeline_mode = #tpu.pipeline_mode<synchronous>, transform_indices = @transform_1, window_bounds = array<i64: 128, 128>}, {pipeline_mode = #tpu.pipeline_mode<synchronous>, transform_indices = @transform_2, window_bounds = array<i64: 1, 128>}, {pipeline_mode = #tpu.pipeline_mode<synchronous>, transform_indices = @transform_3, window_bounds = array<i64: 128, 128>}, {pipeline_mode = #tpu.pipeline_mode<synchronous>, transform_indices = @transform_4, window_bounds = array<i64: 1, 128>}, {transform_indices = @transform_5, window_bounds = array<i64: 128, 128>}, {transform_indices = @transform_6, window_bounds = array<i64: 128, 128>}]} {
    %c0_i32 = arith.constant 0 : i32
    %0 = arith.cmpi eq, %arg1, %c0_i32 : i32
    %1 = arith.extui %0 : i1 to i32
    %c0_i32_0 = arith.constant 0 : i32
    %2 = arith.cmpi ne, %1, %c0_i32_0 : i32
    scf.if %2 {
      %cst_10 = arith.constant 0.000000e+00 : f32
      %12 = vector.broadcast %cst_10 : f32 to vector<128x128xf32>
      %c0_11 = arith.constant 0 : index
      %c0_12 = arith.constant 0 : index
      %13 = vector.load %arg9[%c0_11, %c0_12] : memref<128x128xf32, #tpu.memory_space<vmem>>, vector<128x128xf32>
      tpu.vector_store %arg9[%c0_11, %c0_12], %12 {strides = array<i32>} : memref<128x128xf32, #tpu.memory_space<vmem>>, vector<128x128xf32>,
    } else {
    }
    %c0 = arith.constant 0 : index
    %c0_1 = arith.constant 0 : index
    %3 = vector.load %arg9[%c0, %c0_1] : memref<128x128xf32, #tpu.memory_space<vmem>>, vector<128x128xf32>
    %c0_2 = arith.constant 0 : index
    %c0_3 = arith.constant 0 : index
    %4 = vector.load %arg2[%c0_2, %c0_3] : memref<128x128xbf16, #tpu.memory_space<vmem>>, vector<128x128xbf16>
    %c0_4 = arith.constant 0 : index
    %c0_5 = arith.constant 0 : index
    %5 = vector.load %arg3[%c0_4, %c0_5] : memref<128x128xbf16, #tpu.memory_space<vmem>>, vector<128x128xbf16>
    %cst = arith.constant dense<0.000000e+00> : vector<128x128xf32>
    %6 = tpu.matmul %4, %5, %cst {dimension_numbers = #tpu.dot_dimension_numbers<[1], [0], [0], [1], [0, 0, 1, 1], [], []>} : vector<128x128xbf16>, vector<128x128xbf16>, vector<128x128xf32> -> vector<128x128xf32>
    %7 = arith.addf %3, %6 : vector<128x128xf32>
    %c0_6 = arith.constant 0 : index
    %c0_7 = arith.constant 0 : index
    %8 = vector.load %arg9[%c0_6, %c0_7] : memref<128x128xf32, #tpu.memory_space<vmem>>, vector<128x128xf32>
    tpu.vector_store %arg9[%c0_6, %c0_7], %7 {strides = array<i32>} : memref<128x128xf32, #tpu.memory_space<vmem>>, vector<128x128xf32>,
    %c0_i32_8 = arith.constant 0 : i32
    %9 = arith.cmpi eq, %arg1, %c0_i32_8 : i32
    %10 = arith.extui %9 : i1 to i32
    %c0_i32_9 = arith.constant 0 : i32
    %11 = arith.cmpi ne, %10, %c0_i32_9 : i32
    scf.if %11 {
      %c0_10 = arith.constant 0 : index
      %c0_11 = arith.constant 0 : index
      %12 = vector.load %arg9[%c0_10, %c0_11] : memref<128x128xf32, #tpu.memory_space<vmem>>, vector<128x128xf32>
      %c0_12 = arith.constant 0 : index
      %c0_13 = arith.constant 0 : index
      %13 = vector.load %arg4[%c0_12, %c0_13] : memref<1x128xf32, #tpu.memory_space<vmem>>, vector<1x128xf32>
      %14 = vector.broadcast %13 : vector<1x128xf32> to vector<128x128xf32>
      %15 = arith.addf %12, %14 : vector<128x128xf32>
      %16 = math.tanh %15 : vector<128x128xf32>
      %17 = arith.truncf %16 : vector<128x128xf32> to vector<128x128xbf16>
      %c0_14 = arith.constant 0 : index
      %c0_15 = arith.constant 0 : index
      %18 = vector.load %arg8[%c0_14, %c0_15] : memref<128x128xbf16, #tpu.memory_space<vmem>>, vector<128x128xbf16>
      tpu.vector_store %arg8[%c0_14, %c0_15], %17 {strides = array<i32>} : memref<128x128xbf16, #tpu.memory_space<vmem>>, vector<128x128xbf16>,
      %c0_16 = arith.constant 0 : index
      %c0_17 = arith.constant 0 : index
      %19 = vector.load %arg5[%c0_16, %c0_17] : memref<128x128xbf16, #tpu.memory_space<vmem>>, vector<128x128xbf16>
      %cst_18 = arith.constant dense<0.000000e+00> : vector<128x128xf32>
      %20 = tpu.matmul %17, %19, %cst_18 {dimension_numbers = #tpu.dot_dimension_numbers<[1], [0], [0], [1], [0, 0, 1, 1], [], []>} : vector<128x128xbf16>, vector<128x128xbf16>, vector<128x128xf32> -> vector<128x128xf32>
      %c0_19 = arith.constant 0 : index
      %c0_20 = arith.constant 0 : index
      %21 = vector.load %arg6[%c0_19, %c0_20] : memref<1x128xf32, #tpu.memory_space<vmem>>, vector<1x128xf32>
      %22 = vector.broadcast %21 : vector<1x128xf32> to vector<128x128xf32>
      %23 = arith.addf %20, %22 : vector<128x128xf32>
      %c0_21 = arith.constant 0 : index
      %c0_22 = arith.constant 0 : index
      %24 = vector.load %arg7[%c0_21, %c0_22] : memref<128x128xf32, #tpu.memory_space<vmem>>, vector<128x128xf32>
      tpu.vector_store %arg7[%c0_21, %c0_22], %23 {strides = array<i32>} : memref<128x128xf32, #tpu.memory_space<vmem>>, vector<128x128xf32>,
    } else {
    }
    return
  }
  func.func @transform_0(%arg0: i32, %arg1: i32) -> (i32, i32) {
    %c0_i32 = arith.constant 0 : i32
    return %arg0, %arg1 : i32, i32
  }
  func.func @transform_1(%arg0: i32, %arg1: i32) -> (i32, i32) {
    %c0_i32 = arith.constant 0 : i32
    %c0_i32_0 = arith.constant 0 : i32
    %c0_i32_1 = arith.constant 0 : i32
    return %c0_i32, %c0_i32_0 : i32, i32
  }
  func.func @transform_2(%arg0: i32, %arg1: i32) -> (i32, i32) {
    %c0_i32 = arith.constant 0 : i32
    %c0_i32_0 = arith.constant 0 : i32
    %c0_i32_1 = arith.constant 0 : i32
    return %c0_i32, %c0_i32_0 : i32, i32
  }
  func.func @transform_3(%arg0: i32, %arg1: i32) -> (i32, i32) {
    %c0_i32 = arith.constant 0 : i32
    %c0_i32_0 = arith.constant 0 : i32
    %c0_i32_1 = arith.constant 0 : i32
    return %c0_i32, %c0_i32_0 : i32, i32
  }
  func.func @transform_4(%arg0: i32, %arg1: i32) -> (i32, i32) {
    %c0_i32 = arith.constant 0 : i32
    %c0_i32_0 = arith.constant 0 : i32
    %c0_i32_1 = arith.constant 0 : i32
    return %c0_i32, %c0_i32_0 : i32, i32
  }
  func.func @transform_5(%arg0: i32, %arg1: i32) -> (i32, i32) {
    %c0_i32 = arith.constant 0 : i32
    %c0_i32_0 = arith.constant 0 : i32
    return %arg0, %c0_i32 : i32, i32
  }
  func.func @transform_6(%arg0: i32, %arg1: i32) -> (i32, i32) {
    %c0_i32 = arith.constant 0 : i32
    %c0_i32_0 = arith.constant 0 : i32
    return %arg0, %c0_i32 : i32, i32
  }
}

</mosaic_0001>

<bundles_post_ra>
// kernel: _sent_forward_device.1
= control target key start
LH: loop header
LB: loop body
LE: loop exit
PB: predicated region body
PF: predicated region fallthrough
CT: control target
= control target key end

     0   :  { %s963_s1 = inlined_call_operand.vmem [shape: bf16[128,128], index: 1, kind: input, shape index: {}]   ;;  %s964_s2 = inlined_call_operand.vmem [shape: f32[1,128], index: 2, kind: input, shape index: {}]   ;;  %s965_s0 = inlined_call_operand.vmem [shape: bf16[128,128], index: 0, kind: input, shape index: {}]   ;;  %s966_s3 = inlined_call_operand.vmem [shape: bf16[128,128], index: 3, kind: input, shape index: {}]   ;;  %s967_s4 = inlined_call_operand.vmem [shape: f32[1,128], index: 4, kind: input, shape index: {}]   ;;  %s968_s6 = inlined_call_operand.vmem [shape: bf16[128,128], index: 6, kind: output, shape index: {1}]   ;;  %s969_s5 = inlined_call_operand.vmem [shape: f32[128,128], index: 5, kind: output, shape index: {0}]  }
   0x1   :  { %v654_v0 = vld [vmem:[%s963_s1 + $0x38] sm:$0xff]  ;;  %v653_v1 = vld [vmem:[%s963_s1 + $0x30] sm:$0xff]  ;;  %v652_v2 = vld [vmem:[%s963_s1 + $0x28] sm:$0xff] }
   0x2   :  { %186 = vmatpush.bf16.msra.mxu0 %v654_v0  ;;  %710 = vmatpush.bf16.msra.mxu2 %v654_v0  ;;  %v651_v3 = vld [vmem:[%s963_s1 + $0x20] sm:$0xff]  ;;  %v650_v4 = vld [vmem:[%s963_s1 + $0x18] sm:$0xff]  ;;  %v649_v5 = vld [vmem:[%s963_s1 + $0x10] sm:$0xff] }
   0x3   :  { %v648_v6 = vld [vmem:[%s963_s1 + $0x8] sm:$0xff]  ;;  %v647_v7 = vld [vmem:[%s963_s1] sm:$0xff]  ;;  %v662_v12 = vld [vmem:[%s966_s3 + $0x38] sm:$0xff] }
   0x4   :  { %v639_v8 = vld [vmem:[%s965_s0] sm:$0xff]  ;;  %v640_v10 = vld [vmem:[%s965_s0 + $0x8] sm:$0xff]  ;;  %470 = vmatpush.bf16.msra.mxu1 %v662_v12  ;;  %v661_v13 = vld [vmem:[%s966_s3 + $0x30] sm:$0xff]  ;;  %718 = vmatpush.bf16.msra.mxu3 %v662_v12 }
   0x5   :  { %v643_v9 = vld [vmem:[%s965_s0 + $0x20] sm:$0xff]  ;;  %v644_v11 = vld [vmem:[%s965_s0 + $0x28] sm:$0xff]  ;;  %v641_v14 = vld [vmem:[%s965_s0 + $0x10] sm:$0xff] }
   0x6   :  { %187 = vmatpush.bf16.msra.mxu0 %v653_v1  ;;  %711 = vmatpush.bf16.msra.mxu2 %v653_v1  ;;  %v645_v15 = vld [vmem:[%s965_s0 + $0x30] sm:$0xff]  ;;  %v642_v16 = vld [vmem:[%s965_s0 + $0x18] sm:$0xff]  ;;  %v660_v18 = vld [vmem:[%s966_s3 + $0x28] sm:$0xff] }
   0x7   :  { %v646_v17 = vld [vmem:[%s965_s0 + $0x38] sm:$0xff]  ;;  %v659_v19 = vld [vmem:[%s966_s3 + $0x20] sm:$0xff]  ;;  %v657_v21 = vld [vmem:[%s966_s3 + $0x10] sm:$0xff] }
   0x8   :  { %471 = vmatpush.bf16.msra.mxu1 %v661_v13  ;;  %719 = vmatpush.bf16.msra.mxu3 %v661_v13  ;;  %v658_v20 = vld [vmem:[%s966_s3 + $0x18] sm:$0xff]  ;;  %v656_v22 = vld [vmem:[%s966_s3 + $0x8] sm:$0xff]  ;;  %v655_v23 = vld [vmem:[%s966_s3] sm:$0xff] }
   0x9   :  { %v870_v24 = vld [vmem:[%s964_s2] ss:$0 sm:$0xff] }
   0xa   :  { %188 = vmatpush.bf16.msra.mxu0 %v652_v2  ;;  %712 = vmatpush.bf16.msra.mxu2 %v652_v2 }
   0xc   :  { %472 = vmatpush.bf16.msra.mxu1 %v660_v18  ;;  %720 = vmatpush.bf16.msra.mxu3 %v660_v18 }
   0xe   :  { %189 = vmatpush.bf16.msra.mxu0 %v651_v3  ;;  %713 = vmatpush.bf16.msra.mxu2 %v651_v3 }
  0x10   :  { %473 = vmatpush.bf16.msra.mxu1 %v659_v19  ;;  %721 = vmatpush.bf16.msra.mxu3 %v659_v19 }
  0x12   :  { %190 = vmatpush.bf16.msra.mxu0 %v650_v4  ;;  %714 = vmatpush.bf16.msra.mxu2 %v650_v4 }
  0x14   :  { %474 = vmatpush.bf16.msra.mxu1 %v658_v20  ;;  %722 = vmatpush.bf16.msra.mxu3 %v658_v20 }
  0x16   :  { %191 = vmatpush.bf16.msra.mxu0 %v649_v5  ;;  %715 = vmatpush.bf16.msra.mxu2 %v649_v5 }
  0x18   :  { %475 = vmatpush.bf16.msra.mxu1 %v657_v21  ;;  %723 = vmatpush.bf16.msra.mxu3 %v657_v21 }
  0x1a   :  { %192 = vmatpush.bf16.msra.mxu0 %v648_v6  ;;  %716 = vmatpush.bf16.msra.mxu2 %v648_v6 }
  0x1c   :  { %476 = vmatpush.bf16.msra.mxu1 %v656_v22  ;;  %724 = vmatpush.bf16.msra.mxu3 %v656_v22 }
  0x1e   :  { %193 = vmatpush.bf16.msra.mxu0 %v647_v7  ;;  %717 = vmatpush.bf16.msra.mxu2 %v647_v7 }
  0x20   :  { %477 = vmatpush.bf16.msra.mxu1 %v655_v23  ;;  %725 = vmatpush.bf16.msra.mxu3 %v655_v23 }
  0x21   :  { %194 = vmatmul.bf16.vlgmr.msra.gmra.mxu0 %v639_v8  ;;  %214 = vmatmul.bf16.vlgmr.msra.gmra.mxu2 %v643_v9 }
  0x31   :  { %199 = vmatmul.bf16.gmra.mxu0 %v640_v10  ;;  %219 = vmatmul.bf16.gmra.mxu2 %v644_v11 }
  0x41   :  { %204 = vmatmul.bf16.gmra.mxu0 %v641_v14  ;;  %224 = vmatmul.bf16.gmra.mxu2 %v645_v15 }
  0x51   :  { %209 = vmatmul.bf16.gmra.mxu0 %v642_v16  ;;  %229 = vmatmul.bf16.gmra.mxu2 %v646_v17 }
  0x9e   :  { %v195_v25 = vpop.f32.mrf.mxu0 }
  0x9f   :  { %v290_v26 = vadd.f32 %v870_v24, %v195_v25 }
  0xa1   :  { %728 = vtanh.f32 %v290_v26 }
  0xa4   :  { %v215_v27 = vpop.f32.mrf.mxu2 }
  0xa5   :  { %v298_v29 = vadd.f32 %v870_v24, %v215_v27 }
  0xa6   :  { %v197_v28 = vpop.f32.mrf.mxu0 }
  0xa7   :  { %v291_v30 = vadd.f32 %v870_v24, %v197_v28  ;;  %v729_v31 = vpop.eup %728 }
  0xa8   :  { %v322_v33 = vpack.c.bf16 %v729_v31, %v729_v31 }
  0xa9   :  { %730 = vtanh.f32 %v291_v30 }
  0xaa   :  { %732 = vtanh.f32 %v298_v29  ;;  %v390_v40 = vunpack.c.l.b16 %v322_v33 }
  0xac   :  { %v217_v32 = vpop.f32.mrf.mxu2 }
  0xad   :  { %v299_v34 = vadd.f32 %v870_v24, %v217_v32 }
  0xae   :  { %v200_v35 = vpop.f32.mrf.mxu0 }
  0xaf   :  { %v731_v36 = vpop.eup %730  ;;  %734 = vtanh.f32 %v299_v34  ;;  %v292_v37 = vadd.f32 %v870_v24, %v200_v35 }
  0xb0   :  { %v666_v38 = vpack.c.bf16 %v731_v36, %v729_v31  ;;  %v323_v39 = vpack.c.bf16 %v731_v36, %v731_v36  ;;  %v733_v41 = vpop.eup %732 }
  0xb1   :  { %736 = vtanh.f32 %v292_v37  ;;  %v330_v45 = vpack.c.bf16 %v733_v41, %v733_v41 }
  0xb2   :  { %667 = vst [vmem:[%s968_s6] sm:$0xff] %v666_v38   ;;  %v391_v42 = vunpack.c.l.b16 %v323_v39 }
  0xb3   :  { %v398_v52 = vunpack.c.l.b16 %v330_v45 }
  0xb4   :  { %v220_v43 = vpop.f32.mrf.mxu2  ;;  %v406_v44 = vpack.c.b16 %v391_v42, %v390_v40 }
  0xb5   :  { %v735_v46 = vpop.eup %734  ;;  %v300_v50 = vadd.f32 %v870_v24, %v220_v43 }
  0xb6   :  { %v686_v47 = vpack.c.bf16 %v735_v46, %v733_v41  ;;  %v202_v48 = vpop.f32.mrf.mxu0  ;;  %478 = vmatmul.bf16.vlgmr.msra.gmra.mxu1 %v406_v44  ;;  %v331_v49 = vpack.c.bf16 %v735_v46, %v735_v46 }
  0xb7   :  { %v293_v51 = vadd.f32 %v870_v24, %v202_v48  ;;  %v737_v54 = vpop.eup %736 }
  0xb8   :  { %706 = vst [vmem:[%s968_s6 + $0x20] sm:$0xff] %v686_v47   ;;  %v399_v53 = vunpack.c.l.b16 %v331_v49  ;;  %v324_v57 = vpack.c.bf16 %v737_v54, %v737_v54 }
  0xb9   :  { %738 = vtanh.f32 %v293_v51 }
  0xba   :  { %v410_v55 = vpack.c.b16 %v399_v53, %v398_v52  ;;  %740 = vtanh.f32 %v300_v50  ;;  %v392_v0 = vunpack.c.l.b16 %v324_v57  ;;  %v727_v57 = vld [vmem:[%s967_s4] ss:$0 sm:$0xff] }
  0xbc   :  { %v222_v56 = vpop.f32.mrf.mxu2  ;;  %498 = vmatmul.bf16.vlgmr.msra.gmra.mxu3 %v410_v55 }
  0xbd   :  { %v301_v58 = vadd.f32 %v870_v24, %v222_v56 }
  0xbe   :  { %v205_v59 = vpop.f32.mrf.mxu0 }
  0xbf   :  { %v739_v60 = vpop.eup %738  ;;  %742 = vtanh.f32 %v301_v58  ;;  %v294_v61 = vadd.f32 %v870_v24, %v205_v59 }
  0xc0   :  { %v671_v62 = vpack.c.bf16 %v739_v60, %v737_v54  ;;  %v325_v63 = vpack.c.bf16 %v739_v60, %v739_v60  ;;  %v741_v1 = vpop.eup %740 }
  0xc1   :  { %744 = vtanh.f32 %v294_v61  ;;  %v332_v5 = vpack.c.bf16 %v741_v1, %v741_v1 }
  0xc2   :  { %703 = vst [vmem:[%s968_s6 + $0x8] sm:$0xff] %v671_v62   ;;  %v393_v2 = vunpack.c.l.b16 %v325_v63 }
  0xc3   :  { %v400_v12 = vunpack.c.l.b16 %v332_v5 }
  0xc4   :  { %v225_v3 = vpop.f32.mrf.mxu2  ;;  %v407_v4 = vpack.c.b16 %v393_v2, %v392_v0 }
  0xc5   :  { %v743_v6 = vpop.eup %742  ;;  %v302_v10 = vadd.f32 %v870_v24, %v225_v3 }
  0xc6   :  { %v691_v7 = vpack.c.bf16 %v743_v6, %v741_v1  ;;  %v207_v8 = vpop.f32.mrf.mxu0  ;;  %483 = vmatmul.bf16.gmra.mxu1 %v407_v4  ;;  %v333_v9 = vpack.c.bf16 %v743_v6, %v743_v6 }
  0xc7   :  { %v295_v11 = vadd.f32 %v870_v24, %v207_v8  ;;  %v745_v14 = vpop.eup %744 }
  0xc8   :  { %707 = vst [vmem:[%s968_s6 + $0x28] sm:$0xff] %v691_v7   ;;  %v401_v13 = vunpack.c.l.b16 %v333_v9  ;;  %v326_v17 = vpack.c.bf16 %v745_v14, %v745_v14 }
  0xc9   :  { %746 = vtanh.f32 %v295_v11 }
  0xca   :  { %v411_v15 = vpack.c.b16 %v401_v13, %v400_v12  ;;  %748 = vtanh.f32 %v302_v10  ;;  %v394_v25 = vunpack.c.l.b16 %v326_v17 }
  0xcc   :  { %v227_v16 = vpop.f32.mrf.mxu2  ;;  %503 = vmatmul.bf16.gmra.mxu3 %v411_v15 }
  0xcd   :  { %v303_v18 = vadd.f32 %v870_v24, %v227_v16 }
  0xce   :  { %v210_v19 = vpop.f32.mrf.mxu0 }
  0xcf   :  { %v747_v20 = vpop.eup %746  ;;  %750 = vtanh.f32 %v303_v18  ;;  %v296_v21 = vadd.f32 %v870_v24, %v210_v19 }
  0xd0   :  { %v676_v22 = vpack.c.bf16 %v747_v20, %v745_v14  ;;  %v327_v23 = vpack.c.bf16 %v747_v20, %v747_v20  ;;  %v749_v26 = vpop.eup %748 }
  0xd1   :  { %752 = vtanh.f32 %v296_v21  ;;  %v334_v30 = vpack.c.bf16 %v749_v26, %v749_v26 }
  0xd2   :  { %704 = vst [vmem:[%s968_s6 + $0x10] sm:$0xff] %v676_v22   ;;  %v395_v27 = vunpack.c.l.b16 %v327_v23 }
  0xd3   :  { %v402_v37 = vunpack.c.l.b16 %v334_v30 }
  0xd4   :  { %v230_v28 = vpop.f32.mrf.mxu2  ;;  %v408_v29 = vpack.c.b16 %v395_v27, %v394_v25 }
  0xd5   :  { %v751_v31 = vpop.eup %750  ;;  %v304_v35 = vadd.f32 %v870_v24, %v230_v28 }
  0xd6   :  { %v696_v32 = vpack.c.bf16 %v751_v31, %v749_v26  ;;  %v212_v33 = vpop.f32.mrf.mxu0  ;;  %488 = vmatmul.bf16.gmra.mxu1 %v408_v29  ;;  %v335_v34 = vpack.c.bf16 %v751_v31, %v751_v31 }
  0xd7   :  { %v297_v36 = vadd.f32 %v870_v24, %v212_v33  ;;  %v753_v39 = vpop.eup %752 }
  0xd8   :  { %708 = vst [vmem:[%s968_s6 + $0x30] sm:$0xff] %v696_v32   ;;  %v403_v38 = vunpack.c.l.b16 %v335_v34  ;;  %v328_v42 = vpack.c.bf16 %v753_v39, %v753_v39 }
  0xd9   :  { %754 = vtanh.f32 %v297_v36 }
  0xda   :  { %v412_v40 = vpack.c.b16 %v403_v38, %v402_v37  ;;  %756 = vtanh.f32 %v304_v35  ;;  %v396_v47 = vunpack.c.l.b16 %v328_v42 }
  0xdc   :  { %v232_v41 = vpop.f32.mrf.mxu2  ;;  %508 = vmatmul.bf16.gmra.mxu3 %v412_v40 }
  0xdd   :  { %v305_v43 = vadd.f32 %v870_v24, %v232_v41 }
  0xdf   :  { %v755_v44 = vpop.eup %754  ;;  %758 = vtanh.f32 %v305_v43 }
  0xe0   :  { %v681_v45 = vpack.c.bf16 %v755_v44, %v753_v39  ;;  %v329_v46 = vpack.c.bf16 %v755_v44, %v755_v44  ;;  %v757_v48 = vpop.eup %756 }
  0xe1   :  { %v336_v51 = vpack.c.bf16 %v757_v48, %v757_v48 }
  0xe2   :  { %705 = vst [vmem:[%s968_s6 + $0x18] sm:$0xff] %v681_v45   ;;  %v397_v49 = vunpack.c.l.b16 %v329_v46 }
  0xe3   :  { %v404_v24 = vunpack.c.l.b16 %v336_v51 }
  0xe4   :  { %v409_v50 = vpack.c.b16 %v397_v49, %v396_v47 }
  0xe5   :  { %v759_v52 = vpop.eup %758 }
  0xe6   :  { %v701_v53 = vpack.c.bf16 %v759_v52, %v757_v48  ;;  %493 = vmatmul.bf16.gmra.mxu1 %v409_v50  ;;  %v337_v54 = vpack.c.bf16 %v759_v52, %v759_v52 }
  0xe8   :  { %709 = vst [vmem:[%s968_s6 + $0x38] sm:$0xff] %v701_v53   ;;  %v405_v55 = vunpack.c.l.b16 %v337_v54 }
  0xea   :  { %v413_v56 = vpack.c.b16 %v405_v55, %v404_v24 }
  0xec   :  { %513 = vmatmul.bf16.gmra.mxu3 %v413_v56 }
 0x133   :  { %v479_v58 = vpop.f32.mrf.mxu1 }
 0x134   :  { %v480_v59 = vadd.f32 %v727_v57, %v479_v58 }
 0x136   :  { %519 = vst [vmem:[%s969_s5] sm:$0xff] %v480_v59 }
 0x13b   :  { %v481_v60 = vpop.f32.mrf.mxu1 }
 0x13c   :  { %v482_v61 = vadd.f32 %v727_v57, %v481_v60 }
 0x13e   :  { %520 = vst [vmem:[%s969_s5 + $0x8] sm:$0xff] %v482_v61 }
 0x13f   :  { %v499_v62 = vpop.f32.mrf.mxu3 }
 0x140   :  { %v500_v63 = vadd.f32 %v727_v57, %v499_v62 }
 0x142   :  { %527 = vst [vmem:[%s969_s5 + $0x40] sm:$0xff] %v500_v63 }
 0x143   :  { %v484_v0 = vpop.f32.mrf.mxu1 }
 0x144   :  { %v485_v1 = vadd.f32 %v727_v57, %v484_v0 }
 0x146   :  { %521 = vst [vmem:[%s969_s5 + $0x10] sm:$0xff] %v485_v1 }
 0x147   :  { %v501_v2 = vpop.f32.mrf.mxu3 }
 0x148   :  { %v502_v3 = vadd.f32 %v727_v57, %v501_v2 }
 0x14a   :  { %528 = vst [vmem:[%s969_s5 + $0x48] sm:$0xff] %v502_v3 }
 0x14b   :  { %v486_v4 = vpop.f32.mrf.mxu1 }
 0x14c   :  { %v487_v5 = vadd.f32 %v727_v57, %v486_v4 }
 0x14e   :  { %522 = vst [vmem:[%s969_s5 + $0x18] sm:$0xff] %v487_v5 }
 0x14f   :  { %v504_v6 = vpop.f32.mrf.mxu3 }
 0x150   :  { %v505_v7 = vadd.f32 %v727_v57, %v504_v6 }
 0x152   :  { %529 = vst [vmem:[%s969_s5 + $0x50] sm:$0xff] %v505_v7 }
 0x153   :  { %v489_v8 = vpop.f32.mrf.mxu1 }
 0x154   :  { %v490_v9 = vadd.f32 %v727_v57, %v489_v8 }
 0x156   :  { %523 = vst [vmem:[%s969_s5 + $0x20] sm:$0xff] %v490_v9 }
 0x157   :  { %v506_v10 = vpop.f32.mrf.mxu3 }
 0x158   :  { %v507_v11 = vadd.f32 %v727_v57, %v506_v10 }
 0x15a   :  { %530 = vst [vmem:[%s969_s5 + $0x58] sm:$0xff] %v507_v11 }
 0x15b   :  { %v491_v12 = vpop.f32.mrf.mxu1 }
 0x15c   :  { %v492_v13 = vadd.f32 %v727_v57, %v491_v12 }
 0x15e   :  { %524 = vst [vmem:[%s969_s5 + $0x28] sm:$0xff] %v492_v13 }
 0x15f   :  { %v509_v14 = vpop.f32.mrf.mxu3 }
 0x160   :  { %v510_v15 = vadd.f32 %v727_v57, %v509_v14 }
 0x162   :  { %531 = vst [vmem:[%s969_s5 + $0x60] sm:$0xff] %v510_v15 }
 0x163   :  { %v494_v16 = vpop.f32.mrf.mxu1 }
 0x164   :  { %v495_v17 = vadd.f32 %v727_v57, %v494_v16 }
 0x166   :  { %525 = vst [vmem:[%s969_s5 + $0x30] sm:$0xff] %v495_v17 }
 0x167   :  { %v511_v18 = vpop.f32.mrf.mxu3 }
 0x168   :  { %v512_v19 = vadd.f32 %v727_v57, %v511_v18 }
 0x16a   :  { %532 = vst [vmem:[%s969_s5 + $0x68] sm:$0xff] %v512_v19 }
 0x16b   :  { %v496_v20 = vpop.f32.mrf.mxu1 }
 0x16c   :  { %v497_v21 = vadd.f32 %v727_v57, %v496_v20 }
 0x16e   :  { %526 = vst [vmem:[%s969_s5 + $0x38] sm:$0xff] %v497_v21 }
 0x16f   :  { %v514_v22 = vpop.f32.mrf.mxu3 }
 0x170   :  { %v515_v23 = vadd.f32 %v727_v57, %v514_v22 }
 0x172   :  { %533 = vst [vmem:[%s969_s5 + $0x70] sm:$0xff] %v515_v23 }
 0x177   :  { %v516_v25 = vpop.f32.mrf.mxu3 }
 0x178   :  { %v517_v26 = vadd.f32 %v727_v57, %v516_v25 }
 0x17a   :  { %534 = vst [vmem:[%s969_s5 + $0x78] sm:$0xff] %v517_v26 }

</bundles_post_ra>
